<compile_context>
chip_gen: v5e
topology: v5e:2x2
jax: 0.10.0
libtpu: 0.0.40
codegen_flags: <defaults>
</compile_context>

<pallas_src>
import jax
import jax.numpy as jnp
from jax.experimental import pallas as pl
from jax.experimental.pallas import tpu as pltpu


def _swish_kernel(x_ref, beta_ref, o_ref):
    # x_ref/o_ref: (tile_r, tile_d) VMEM tiles; beta_ref: (1, tile_d) resident tile.
    x = x_ref[...].astype(jnp.float32)
    beta = beta_ref[...].astype(jnp.float32)          # (1, tile_d) -> broadcasts over rows
    o_ref[...] = (x * jax.nn.sigmoid(beta * x)).astype(o_ref.dtype)


def _largest_aligned_divisor(n, align, cap):
    """Largest t with n % t == 0, t % align == 0, t <= cap (None if no such t)."""
    t = (min(cap, n) // align) * align
    while t >= align:
        if n % t == 0:
            return t
        t -= align
    return None


def swish(x, beta, *, target_tile_bytes=2 * 1024 * 1024):
    """x: (B, D), beta: (1, D). Returns (B, D) in x.dtype."""
    B, D = x.shape
    assert beta.shape == (1, D)
    dtype = x.dtype
    itemsize = jnp.dtype(dtype).itemsize
    sublane = max(8, 32 // itemsize)          # 8 for f32, 16 for bf16, 32 for int8/fp8

    # ---- lane-dense layout --------------------------------------------------
    if D % 128 == 0:
        rows, lanes = B, D
        x2, beta2 = x, beta
    elif 128 % D == 0 and (B * D) % 128 == 0:
        # Fold rows so the lane axis is a big multiple of 128 (unmasked stores).
        # Each folded row holds (lanes // D) complete original rows, so a tiled
        # (1, lanes) beta reproduces the per-feature pattern exactly and stays
        # tiny/resident (no full (B, D) broadcast materialized in HBM).
        lanes = 128
        for cand in (2048, 1024, 512, 256, 128):
            if (B * D) % cand == 0:
                lanes = cand
                break
        rows = (B * D) // lanes
        x2 = x.reshape(rows, lanes)
        beta2 = jnp.tile(beta, (1, lanes // D))
    else:
        # D neither a multiple nor a divisor of 128: keep layout; a full-extent
        # lane block is still legal (masked stores at the lane edge, but correct).
        rows, lanes = B, D
        x2, beta2 = x, beta

    # ---- lane-axis tile (multiple of 128 dividing lanes, or full extent) -----
    if lanes % 128 == 0:
        cap_d = max(128, (target_tile_bytes // (sublane * itemsize)) // 128 * 128)
        tile_d = _largest_aligned_divisor(lanes, 128, cap_d) or lanes
    else:
        tile_d = lanes

    # ---- row-axis tile: sublane-aligned, ~target_tile_bytes, never > rows -----
    cap_r = max(sublane, (target_tile_bytes // (tile_d * itemsize)) // sublane * sublane)
    tile_r = min(cap_r, rows)   # == rows -> full-extent block; == cap_r -> 8-aligned block

    grid = (pl.cdiv(rows, tile_r), pl.cdiv(lanes, tile_d))

    out = pl.pallas_call(
        _swish_kernel,
        out_shape=jax.ShapeDtypeStruct((rows, lanes), dtype),
        grid=grid,
        in_specs=[
            pl.BlockSpec((tile_r, tile_d), lambda i, j: (i, j)),   # x tile
            pl.BlockSpec((1, tile_d), lambda i, j: (0, j)),        # beta tile (resident per lane-block)
        ],
        out_specs=pl.BlockSpec((tile_r, tile_d), lambda i, j: (i, j)),
        compiler_params=pltpu.CompilerParams(
            dimension_semantics=("parallel", "parallel"),
        ),
    )(x2, beta2)

    return out.reshape(B, D)


if __name__ == "__main__":
    key = jax.random.PRNGKey(0)
    k1, k2 = jax.random.split(key)

    # Case 1: matches the PyTorch module usage (dim=32 < 128 -> lane-dense fold path).
    batch, dim = 8, 32
    x = jax.random.normal(k1, (batch, dim), dtype=jnp.float32)
    beta = jnp.ones((1, dim), dtype=jnp.float32)   # nn.Parameter(torch.ones((1, dim)))
    out = jax.block_until_ready(swish(x, beta))
    ref = x * jax.nn.sigmoid(beta * x)
    assert out.shape == (batch, dim)
    assert jnp.allclose(out, ref, atol=1e-6, rtol=1e-6)

    # Case 2: dim multiple of 128, non-sublane-aligned batch -> full-extent row block,
    #         no host-side padding copies.
    batch2, dim2 = 20, 128
    x2 = jax.random.normal(k2, (batch2, dim2), dtype=jnp.float32)
    beta2 = 0.5 + jax.random.uniform(jax.random.PRNGKey(1), (1, dim2), dtype=jnp.float32)
    out2 = jax.block_until_ready(swish(x2, beta2))
    ref2 = x2 * jax.nn.sigmoid(beta2 * x2)
    assert out2.shape == (batch2, dim2)
    assert jnp.allclose(out2, ref2, atol=1e-6, rtol=1e-6)

    print("KERNEL_OK")
</pallas_src>

<mosaic_0001>
module attributes {stable_mosaic.version = 11 : i64} {
  func.func @_swish_kernel(%arg0: i32, %arg1: i32, %arg2: memref<1x256xf32, #tpu.memory_space<vmem>>, %arg3: memref<1x256xf32, #tpu.memory_space<vmem>>, %arg4: memref<1x256xf32, #tpu.memory_space<vmem>>) attributes {dimension_semantics = [#tpu.dimension_semantics<parallel>, #tpu.dimension_semantics<parallel>], iteration_bounds = array<i64: 1, 1>, scalar_prefetch = 0 : i64, scratch_operands = 0 : i64, tpu.core_type = #tpu.core_type<tc>, window_params = [{transform_indices = @transform_0, window_bounds = array<i64: 1, 256>}, {transform_indices = @transform_1, window_bounds = array<i64: 1, 256>}, {transform_indices = @transform_2, window_bounds = array<i64: 1, 256>}]} {
    %c0 = arith.constant 0 : index
    %c0_0 = arith.constant 0 : index
    %0 = vector.load %arg2[%c0, %c0_0] : memref<1x256xf32, #tpu.memory_space<vmem>>, vector<1x256xf32>
    %c0_1 = arith.constant 0 : index
    %c0_2 = arith.constant 0 : index
    %1 = vector.load %arg3[%c0_1, %c0_2] : memref<1x256xf32, #tpu.memory_space<vmem>>, vector<1x256xf32>
    %2 = arith.mulf %1, %0 : vector<1x256xf32>
    %3 = arith.negf %2 : vector<1x256xf32>
    %4 = math.exp %3 : vector<1x256xf32>
    %cst = arith.constant 1.000000e+00 : f32
    %5 = vector.broadcast %cst : f32 to vector<1x256xf32>
    %6 = arith.addf %5, %4 : vector<1x256xf32>
    %7 = arith.divf %5, %6 : vector<1x256xf32>
    %8 = arith.mulf %0, %7 : vector<1x256xf32>
    %c0_3 = arith.constant 0 : index
    %c0_4 = arith.constant 0 : index
    %9 = vector.load %arg4[%c0_3, %c0_4] : memref<1x256xf32, #tpu.memory_space<vmem>>, vector<1x256xf32>
    tpu.vector_store %arg4[%c0_3, %c0_4], %8 {strides = array<i32>} : memref<1x256xf32, #tpu.memory_space<vmem>>, vector<1x256xf32>,
    return
  }
  func.func @transform_0(%arg0: i32, %arg1: i32) -> (i32, i32) {
    %c0_i32 = arith.constant 0 : i32
    return %arg0, %arg1 : i32, i32
  }
  func.func @transform_1(%arg0: i32, %arg1: i32) -> (i32, i32) {
    %c0_i32 = arith.constant 0 : i32
    %c0_i32_0 = arith.constant 0 : i32
    return %c0_i32, %arg1 : i32, i32
  }
  func.func @transform_2(%arg0: i32, %arg1: i32) -> (i32, i32) {
    %c0_i32 = arith.constant 0 : i32
    return %arg0, %arg1 : i32, i32
  }
}

</mosaic_0001>

<bundles_post_ra>
// kernel: tpu_custom_call.1
= control target key start
LH: loop header
LB: loop body
LE: loop exit
PB: predicated region body
PF: predicated region fallthrough
CT: control target
= control target key end

     0   :  { %7 = vsyncpa [#allocation3], 0  ;;  %s199_s0 = inlined_call_operand.hbm [shape: f32[1,256], index: 0, kind: input, shape index: {}]   ;;  %s200_s1 = inlined_call_operand.hbm [shape: f32[1,256], index: 1, kind: input, shape index: {}]   ;;  %s201_s2 = inlined_call_operand.hbm [shape: f32[1,256], index: 2, kind: output, shape index: {}]  }
   0x1   :  { %8 = vsyncpa [#allocation6], 0 }
   0x2   :  { %9 = vsyncpa [#allocation4], 0  ;;  %s15_s11 = sshll.u32 %s199_s0, 4  ;;  %s172_s12 = smov [#allocation2]   ;;  %s16_s11 = int_to_ptr.hbm [resolvable:$true] %s15_s11 }
   0x3   :  { %s17_s13 = sshll.u32 %s172_s12, 4  ;;  %s26_s16 = sshll.u32 %s200_s1, 4  ;;  %s18_s13 = int_to_ptr.vmem [resolvable:$true] %s17_s13  ;;  %s27_s16 = int_to_ptr.hbm [resolvable:$true] %s26_s16 }
   0x4   :  { %20 = dma.hbm_to_vmem [thread:$0]  %s16_s11, 32, %s18_s13, [#allocation3]  }
   0x5   :  { %s173_s17 = smov [#allocation5]  }
   0x6   :  { %s28_s18 = sshll.u32 %s173_s17, 4  ;;  %s29_s18 = int_to_ptr.vmem [resolvable:$true] %s28_s18 }
   0x7   :  { %31 = dma.hbm_to_vmem [thread:$0]  %s27_s16, 32, %s29_s18, [#allocation6]  }
   0x8   :  { %166 = dma.done.wait [#allocation3], 32  }
   0x9   :  { %167 = vsyncadd [#allocation3], 4294967264 }
   0xa   :  { %168 = dma.done.wait [#allocation6], 32  }
   0xb   :  { %169 = vsyncadd [#allocation6], 4294967264  ;;  %v40_v0 = vld [vmem:[#allocation2] sm:$0x3]  ;;  %v41_v1 = vld [vmem:[#allocation5] sm:$0x3]  ;;  %v63_v13 = vlaneseq }
   0xc   :  { %v42_v2 = vmul.f32 %v41_v1, %v40_v0  ;;  %s174_s0 = smov [#allocation7]   ;;  %s75_s21 = sshll.u32 %s201_s2, 4  ;;  %s76_s21 = int_to_ptr.hbm [resolvable:$true] %s75_s21 }
   0xd   :  { %s73_s1 = sshll.u32 %s174_s0, 4  ;;  %vm65_vm4 = vcmp.lt.s32.totalorder %v63_v13, 256  ;;  %s74_s1 = int_to_ptr.vmem [resolvable:$true] %s73_s1 }
   0xe   :  { %v86_v3 = vmul.f32 -1.442695, %v42_v2 }
  0x10   :  { %90 = vpow2.f32 %v86_v3 }
  0x16   :  { %v91_v4 = vpop.eup %90 }
  0x17   :  { %v46_v5 = vadd.f32 1.0, %v91_v4 }
  0x19   :  { %92 = vrcp.f32 %v46_v5  ;;  %v58_v8 = vand.u32 2147483648, %v46_v5  ;;  %vm52_vm0 = vweird.f32 %v46_v5  ;;  %v56_v10 = vand.u32 2147483647, %v46_v5 }
  0x1b   :  { %v59_v12 = vor.u32 1.1754944e-38, %v58_v8  ;;  %vm57_vm3 = vcmp.eq.f32.partialorder %v56_v10, 8.507059e+37 }
  0x1f   :  { %v93_v6 = vpop.eup %92 }
  0x20   :  { %v48_v7 = vmul.f32 %v93_v6, %v46_v5  ;;  %vm53_vm1 = vweird.f32 %v93_v6 }
  0x21   :  { %vm54_vm2 = vmor %vm52_vm0, %vm53_vm1 }
  0x22   :  { %v49_v9 = vsub.f32 1.0, %v48_v7 }
  0x24   :  { %v50_v11 = vmul.f32 %v93_v6, %v49_v9 }
  0x26   :  { %v51_v14 = vadd.f32 %v93_v6, %v50_v11 }
  0x28   :  { %v55_v15 = vsel %vm54_vm2, %v93_v6, %v51_v14 }
  0x29   :  { %v60_v16 = vsel %vm57_vm3, %v59_v12, %v55_v15 }
  0x2a   :  { %v62_v17 = vmul.f32 %v60_v16, %v40_v0 }
  0x2c   :  { %67 = vst.msk [vmem:[#allocation7] sm:$0x3] %vm65_vm4, %v62_v17 }
  0x2d   :  { %78 = dma.vmem_to_hbm [thread:$0]  %s74_s1, 32, %s76_s21, [#allocation4]  }
  0x2e   :  { %170 = dma.done.wait [#allocation4], 32  }
  0x2f   :  { %171 = vsyncadd [#allocation4], 4294967264 }
  0x30   :  { %83 = vsyncpa [#allocation3], 1 }
  0x31   :  { %84 = vsyncpa [#allocation6], 1 }
  0x32   :  { %85 = vsyncpa [#allocation4], 1 }

</bundles_post_ra>
